<compile_context>
chip_gen: v7x
topology: tpu7x:2x2x1
jax: 0.10.0
libtpu: 0.0.40
codegen_flags: <defaults>
</compile_context>

<pallas_src>
import jax
import jax.numpy as jnp
from jax.experimental import pallas as pl
from jax.experimental.pallas import tpu as pltpu

OBS_DIM = 32
ACT_DIM = 6
HIDDEN = 64
LANES = 128          # lane width of the hidden activations / W1,W2 slab
SUBLANE = 8          # f32 sublane count
PAD16 = 16           # padded action-input / output lane width (bf16 sublane tile)
W1_ROWS = OBS_DIM + PAD16        # 48  (obs rows | action rows)
W12_ROWS = W1_ROWS + LANES       # 176 (W1 | W2)
TB_MAX = 1024        # max batch-tile rows per grid step
MIN_SPLIT_B = 64     # batches >= this are split into >=2 tiles (v7x: 2 TensorCores)

BATCH = 4


# ----------------------------- Pallas kernels -------------------------------


def _qac_kernel(obs_ref, act_ref, w12_ref, w3_ref, b12_ref, b3m_ref, out_ref):
    """Fused actor + critic MLP.

    obs_ref : (TB, 32)   bf16 observation
    act_ref : (TB, 16)   bf16 action in lanes 0:6 (zeros for actor-only calls)
    w12_ref : (176, 128) bf16  rows 0:32 W1(obs rows), 32:48 W1(action rows), 48:176 W2
                               (block-diagonal: lanes 0:64 actor, 64:128 critic)
    w3_ref  : (128, 16)  bf16  cols 0:6 actor W3, col 6 critic W3, rest zero
    b12_ref : (8, 128)   f32   row0 = b1, row1 = b2
    b3m_ref : (8, 16)    f32   row0 = b3 (lanes 0:6 actor bias, lane 6 critic bias),
                               row1 = actor lane mask (1.0 in lanes 0:6)
    out_ref : (TB, 16)   f32   action in lanes 0:6 (tanh), q in lane 6
    """
    w1o = w12_ref[0:OBS_DIM, :]
    w1a = w12_ref[OBS_DIM:W1_ROWS, :]
    w2 = w12_ref[W1_ROWS:W12_ROWS, :]
    w3 = w3_ref[...]
    b1 = b12_ref[0:1, :]
    b2 = b12_ref[1:2, :]
    b3 = b3m_ref[0:1, :]
    amask = b3m_ref[1:2, :]

    # Layer 1: lanes 0:64 actor hidden, 64:128 critic hidden (cat[obs,act] via packed W1).
    h = (jnp.dot(obs_ref[...], w1o, preferred_element_type=jnp.float32)
         + jnp.dot(act_ref[...], w1a, preferred_element_type=jnp.float32) + b1)
    h = jnp.maximum(h, 0.0)
    # Layer 2 (block-diagonal).
    h = jnp.maximum(
        jnp.dot(h.astype(jnp.bfloat16), w2, preferred_element_type=jnp.float32) + b2, 0.0)
    # Layer 3 (narrow output): lanes 0:6 actor pre-tanh, lane 6 critic q.
    y = jnp.dot(h.astype(jnp.bfloat16), w3, preferred_element_type=jnp.float32) + b3
    # final_tanh only on actor lanes (mask DMA'd with the biases); q stays linear.
    out_ref[...] = y + amask * (jnp.tanh(y) - y)


def _policy_q_kernel(obs_ref, w12_ref, w3_ref, b12_ref, b3m_ref, out_ref):
    """Fused DDPG/SAC policy-loss path: q(obs, tanh(actor(obs))) in one kernel."""
    w1o = w12_ref[0:OBS_DIM, :]
    w1a = w12_ref[OBS_DIM:W1_ROWS, :]
    w2 = w12_ref[W1_ROWS:W12_ROWS, :]
    w3 = w3_ref[...]
    b1 = b12_ref[0:1, :]
    b2 = b12_ref[1:2, :]
    b3 = b3m_ref[0:1, :]
    amask = b3m_ref[1:2, :]

    obs = obs_ref[...]
    # Layer-1 pre-activation with zero action (reused by the critic pass below).
    z1 = jnp.dot(obs, w1o, preferred_element_type=jnp.float32) + b1

    # ---- actor pass ----
    h = jnp.maximum(z1, 0.0)
    h = jnp.maximum(
        jnp.dot(h.astype(jnp.bfloat16), w2, preferred_element_type=jnp.float32) + b2, 0.0)
    y = jnp.dot(h.astype(jnp.bfloat16), w3, preferred_element_type=jnp.float32) + b3
    a16 = amask * jnp.tanh(y)              # action in lanes 0:6, zeros elsewhere

    # ---- critic pass with a = tanh(actor(obs)) (action rows of W1 only touch critic lanes) ----
    z1c = z1 + jnp.dot(a16.astype(jnp.bfloat16), w1a, preferred_element_type=jnp.float32)
    h = jnp.maximum(z1c, 0.0)
    h = jnp.maximum(
        jnp.dot(h.astype(jnp.bfloat16), w2, preferred_element_type=jnp.float32) + b2, 0.0)
    y2 = jnp.dot(h.astype(jnp.bfloat16), w3, preferred_element_type=jnp.float32) + b3
    out_ref[...] = y2 + amask * (jnp.tanh(y2) - y2)   # lanes 0:6 action, lane 6 q


# --------------------------- pallas_call wrappers ----------------------------


_WEIGHT_SPECS = [
    pl.BlockSpec((W12_ROWS, LANES), lambda i: (0, 0)),   # constant -> VMEM-resident
    pl.BlockSpec((LANES, PAD16), lambda i: (0, 0)),
    pl.BlockSpec((SUBLANE, LANES), lambda i: (0, 0)),
    pl.BlockSpec((SUBLANE, PAD16), lambda i: (0, 0)),
]


def _run_qac(obs_p, act_p, w12, w3, b12, b3m, tb):
    b_pad = obs_p.shape[0]
    return pl.pallas_call(
        _qac_kernel,
        out_shape=jax.ShapeDtypeStruct((b_pad, PAD16), jnp.float32),
        grid_spec=pltpu.PrefetchScalarGridSpec(
            num_scalar_prefetch=0,
            grid=(b_pad // tb,),
            in_specs=[
                pl.BlockSpec((tb, OBS_DIM), lambda i: (i, 0)),
                pl.BlockSpec((tb, PAD16), lambda i: (i, 0)),
            ] + _WEIGHT_SPECS,
            out_specs=pl.BlockSpec((tb, PAD16), lambda i: (i, 0)),
        ),
        compiler_params=pltpu.CompilerParams(
            dimension_semantics=("parallel",)),   # batch grid -> both v7x TCs
    )(obs_p, act_p, w12, w3, b12, b3m)


def _run_policy_q(obs_p, w12, w3, b12, b3m, tb):
    b_pad = obs_p.shape[0]
    return pl.pallas_call(
        _policy_q_kernel,
        out_shape=jax.ShapeDtypeStruct((b_pad, PAD16), jnp.float32),
        grid_spec=pltpu.PrefetchScalarGridSpec(
            num_scalar_prefetch=0,
            grid=(b_pad // tb,),
            in_specs=[pl.BlockSpec((tb, OBS_DIM), lambda i: (i, 0))] + _WEIGHT_SPECS,
            out_specs=pl.BlockSpec((tb, PAD16), lambda i: (i, 0)),
        ),
        compiler_params=pltpu.CompilerParams(
            dimension_semantics=("parallel",)),
    )(obs_p, w12, w3, b12, b3m)


# ------------------------ params, packing, wrapper --------------------------


def _linear_init(key, fan_in, fan_out):
    """PyTorch nn.Linear default init: U(-1/sqrt(fan_in), 1/sqrt(fan_in))."""
    kw, kb = jax.random.split(key)
    bound = 1.0 / jnp.sqrt(float(fan_in))
    w = jax.random.uniform(kw, (fan_in, fan_out), jnp.float32, -bound, bound)
    b = jax.random.uniform(kb, (1, fan_out), jnp.float32, -bound, bound)
    return w, b


def init_params(seed=0):
    key = jax.random.PRNGKey(seed)
    ks = jax.random.split(key, 6)
    p = {}
    # actor: Linear(obs,64) -> Linear(64,64) -> Linear(64,act) [+tanh]
    p["a_w1"], p["a_b1"] = _linear_init(ks[0], OBS_DIM, HIDDEN)
    p["a_w2"], p["a_b2"] = _linear_init(ks[1], HIDDEN, HIDDEN)
    p["a_w3"], p["a_b3"] = _linear_init(ks[2], HIDDEN, ACT_DIM)
    # critic: Linear(obs+act,64) -> Linear(64,64) -> Linear(64,1)
    p["c_w1"], p["c_b1"] = _linear_init(ks[3], OBS_DIM + ACT_DIM, HIDDEN)
    p["c_w2"], p["c_b2"] = _linear_init(ks[4], HIDDEN, HIDDEN)
    p["c_w3"], p["c_b3"] = _linear_init(ks[5], HIDDEN, 1)
    return p


def pack_params(p):
    """Pack actor+critic weights into bf16 MXU slabs and f32 bias/mask slabs."""
    w12 = jnp.zeros((W12_ROWS, LANES), jnp.float32)
    # W1: obs rows 0:32 (actor cols 0:64, critic cols 64:128), action rows 32:38 (critic only)
    w12 = w12.at[0:OBS_DIM, 0:HIDDEN].set(p["a_w1"])
    w12 = w12.at[0:OBS_DIM, HIDDEN:].set(p["c_w1"][:OBS_DIM])
    w12 = w12.at[OBS_DIM:OBS_DIM + ACT_DIM, HIDDEN:].set(p["c_w1"][OBS_DIM:])
    # W2 block-diagonal
    w12 = w12.at[W1_ROWS:W1_ROWS + HIDDEN, 0:HIDDEN].set(p["a_w2"])
    w12 = w12.at[W1_ROWS + HIDDEN:, HIDDEN:].set(p["c_w2"])
    w12 = w12.astype(jnp.bfloat16)

    # W3 narrow: cols 0:6 actor action, col 6 critic q
    w3 = jnp.zeros((LANES, PAD16), jnp.float32)
    w3 = w3.at[0:HIDDEN, 0:ACT_DIM].set(p["a_w3"])
    w3 = w3.at[HIDDEN:, ACT_DIM:ACT_DIM + 1].set(p["c_w3"])
    w3 = w3.astype(jnp.bfloat16)

    # f32 biases (bias / ReLU / tanh math stays f32)
    b12 = jnp.zeros((SUBLANE, LANES), jnp.float32)
    b12 = b12.at[0, 0:HIDDEN].set(p["a_b1"][0]).at[0, HIDDEN:].set(p["c_b1"][0])
    b12 = b12.at[1, 0:HIDDEN].set(p["a_b2"][0]).at[1, HIDDEN:].set(p["c_b2"][0])

    b3m = jnp.zeros((SUBLANE, PAD16), jnp.float32)
    b3m = b3m.at[0, 0:ACT_DIM].set(p["a_b3"][0])
    b3m = b3m.at[0, ACT_DIM].set(p["c_b3"][0, 0])
    b3m = b3m.at[1, 0:ACT_DIM].set(1.0)                 # actor-lane tanh mask
    return w12, w3, b12, b3m


def _round_up(x, m):
    return ((x + m - 1) // m) * m


def _tiling(b):
    """Batch-tile size & padded batch: minimal padding, >=2 (even) tiles for large b."""
    ntiles = -(-b // TB_MAX)
    if ntiles < 2 and b >= MIN_SPLIT_B:
        ntiles = 2                    # v7x: give both TensorCores work
    if ntiles > 1 and ntiles % 2:
        ntiles += 1
    tb = _round_up(-(-b // ntiles), PAD16)   # 16-row alignment (bf16 sublane tile)
    return tb, ntiles * tb


class ContinuousQACPallas:
    """Pallas port of ding ContinuousQAC (regression, vector obs, no twin critic)."""

    mode = ["compute_actor", "compute_critic"]

    def __init__(self, params):
        self.params = params
        self.w12, self.w3, self.b12, self.b3m = pack_params(params)

    def __call__(self, inputs, mode):
        assert mode in self.mode
        return getattr(self, mode)(inputs)

    # ---- input prep: just pad batch to the tile multiple (no fat zero slab) ----
    def _prep(self, obs, action):
        b = obs.shape[0]
        tb, b_pad = _tiling(b)
        obs_p = jnp.pad(obs.astype(jnp.bfloat16), ((0, b_pad - b), (0, 0)))
        if action is None:
            act_p = jnp.zeros((b_pad, PAD16), jnp.bfloat16)
        else:
            act_p = jnp.pad(action.astype(jnp.bfloat16),
                            ((0, b_pad - b), (0, PAD16 - action.shape[1])))
        return obs_p, act_p, tb, b

    def compute_actor(self, obs):
        obs_p, act_p, tb, b = self._prep(obs, None)
        out = _run_qac(obs_p, act_p, self.w12, self.w3, self.b12, self.b3m, tb)
        return {"action": out[:b, :ACT_DIM]}

    def compute_critic(self, inputs):
        obs, action = inputs["obs"], inputs["action"]
        if action.ndim == 1:
            action = action[:, None]
        obs_p, act_p, tb, b = self._prep(obs, action)
        out = _run_qac(obs_p, act_p, self.w12, self.w3, self.b12, self.b3m, tb)
        return {"q_value": out[:b, ACT_DIM]}           # RegressionHead squeeze -> (B,)

    def compute_actor_critic(self, inputs):
        """Both heads from one kernel launch when obs & action are both given."""
        obs, action = inputs["obs"], inputs["action"]
        if action.ndim == 1:
            action = action[:, None]
        obs_p, act_p, tb, b = self._prep(obs, action)
        out = _run_qac(obs_p, act_p, self.w12, self.w3, self.b12, self.b3m, tb)
        o = out[:b]                                    # slice the slab once
        return {"action": o[:, :ACT_DIM], "q_value": o[:, ACT_DIM]}

    def compute_policy_q(self, obs):
        """Fused q(obs, tanh(actor(obs))) — DDPG/SAC policy-loss path, one launch."""
        b = obs.shape[0]
        tb, b_pad = _tiling(b)
        obs_p = jnp.pad(obs.astype(jnp.bfloat16), ((0, b_pad - b), (0, 0)))
        out = _run_policy_q(obs_p, self.w12, self.w3, self.b12, self.b3m, tb)
        o = out[:b]
        return {"action": o[:, :ACT_DIM], "q_value": o[:, ACT_DIM]}


# ----------------------------- reference (JAX, f32) --------------------------


def _ref_actor(obs, p):
    h = jnp.maximum(obs @ p["a_w1"] + p["a_b1"], 0.0)
    h = jnp.maximum(h @ p["a_w2"] + p["a_b2"], 0.0)
    return jnp.tanh(h @ p["a_w3"] + p["a_b3"])


def _ref_critic(obs, act, p):
    x = jnp.concatenate([obs, act], axis=1)
    h = jnp.maximum(x @ p["c_w1"] + p["c_b1"], 0.0)
    h = jnp.maximum(h @ p["c_w2"] + p["c_b2"], 0.0)
    return (h @ p["c_w3"] + p["c_b3"])[:, 0]


if __name__ == "__main__":
    key = jax.random.PRNGKey(0)
    k_obs, k_act, k_obs2, k_act2 = jax.random.split(key, 4)

    params = init_params(seed=0)
    model = ContinuousQACPallas(params)
    TOL = dict(atol=3e-2, rtol=3e-2)   # bf16 MXU operands vs f32 reference

    # ---- small batch (grid=(1,)) ----
    obs = jax.random.normal(k_obs, (BATCH, OBS_DIM), jnp.float32)
    action = jnp.tanh(jax.random.normal(k_act, (BATCH, ACT_DIM), jnp.float32))

    a = model(obs, "compute_actor")["action"]
    q = model({"obs": obs, "action": action}, "compute_critic")["q_value"]
    both = model.compute_actor_critic({"obs": obs, "action": action})
    pq = model.compute_policy_q(obs)
    jax.block_until_ready((a, q, both["action"], both["q_value"],
                           pq["action"], pq["q_value"]))

    assert a.shape == (BATCH, ACT_DIM) and a.dtype == jnp.float32
    assert q.shape == (BATCH,) and q.dtype == jnp.float32

    a_ref = _ref_actor(obs, params)
    q_ref = _ref_critic(obs, action, params)
    pq_ref = _ref_critic(obs, a_ref, params)
    assert jnp.allclose(a, a_ref, **TOL)
    assert jnp.allclose(q, q_ref, **TOL)
    assert jnp.allclose(both["action"], a_ref, **TOL)
    assert jnp.allclose(both["q_value"], q_ref, **TOL)
    assert jnp.allclose(pq["action"], a_ref, **TOL)
    assert jnp.allclose(pq["q_value"], pq_ref, **TOL)

    # ---- medium batch (exercises >=2-tile grid / v7x split rule) ----
    B2 = 72
    obs2 = jax.random.normal(k_obs2, (B2, OBS_DIM), jnp.float32)
    action2 = jnp.tanh(jax.random.normal(k_act2, (B2, ACT_DIM), jnp.float32))
    a2 = model(obs2, "compute_actor")["action"]
    q2 = model({"obs": obs2, "action": action2}, "compute_critic")["q_value"]
    jax.block_until_ready((a2, q2))
    assert a2.shape == (B2, ACT_DIM) and q2.shape == (B2,)
    assert jnp.allclose(a2, _ref_actor(obs2, params), **TOL)
    assert jnp.allclose(q2, _ref_critic(obs2, action2, params), **TOL)

    # TODO(synk): 'reparameterization'/'hybrid' action spaces, ConvEncoder image obs
    # and twin_critic are outside this config and not implemented here.

    print("KERNEL_OK")
</pallas_src>

<mosaic_0001>
module attributes {stable_mosaic.version = 11 : i64} {
  func.func @_qac_kernel(%arg0: i32, %arg1: memref<16x32xbf16, #tpu.memory_space<vmem>>, %arg2: memref<16x16xbf16, #tpu.memory_space<vmem>>, %arg3: memref<176x128xbf16, #tpu.memory_space<vmem>>, %arg4: memref<128x16xbf16, #tpu.memory_space<vmem>>, %arg5: memref<8x128xf32, #tpu.memory_space<vmem>>, %arg6: memref<8x16xf32, #tpu.memory_space<vmem>>, %arg7: memref<16x16xf32, #tpu.memory_space<vmem>>) attributes {dimension_semantics = [#tpu.dimension_semantics<parallel>], iteration_bounds = array<i64: 1>, scalar_prefetch = 0 : i64, scratch_operands = 0 : i64, tpu.core_type = #tpu.core_type<tc>, window_params = [{transform_indices = @transform_0, window_bounds = array<i64: 16, 32>}, {transform_indices = @transform_1, window_bounds = array<i64: 16, 16>}, {pipeline_mode = #tpu.pipeline_mode<synchronous>, transform_indices = @transform_2, window_bounds = array<i64: 176, 128>}, {pipeline_mode = #tpu.pipeline_mode<synchronous>, transform_indices = @transform_3, window_bounds = array<i64: 128, 16>}, {pipeline_mode = #tpu.pipeline_mode<synchronous>, transform_indices = @transform_4, window_bounds = array<i64: 8, 128>}, {pipeline_mode = #tpu.pipeline_mode<synchronous>, transform_indices = @transform_5, window_bounds = array<i64: 8, 16>}, {transform_indices = @transform_6, window_bounds = array<i64: 16, 16>}]} {
    %c0 = arith.constant 0 : index
    %c0_0 = arith.constant 0 : index
    %0 = vector.load %arg3[%c0, %c0_0] : memref<176x128xbf16, #tpu.memory_space<vmem>>, vector<32x128xbf16>
    %c32 = arith.constant 32 : index
    %c0_1 = arith.constant 0 : index
    %1 = vector.load %arg3[%c32, %c0_1] : memref<176x128xbf16, #tpu.memory_space<vmem>>, vector<16x128xbf16>
    %c48 = arith.constant 48 : index
    %c0_2 = arith.constant 0 : index
    %2 = vector.load %arg3[%c48, %c0_2] : memref<176x128xbf16, #tpu.memory_space<vmem>>, vector<128x128xbf16>
    %c0_3 = arith.constant 0 : index
    %c0_4 = arith.constant 0 : index
    %3 = vector.load %arg4[%c0_3, %c0_4] : memref<128x16xbf16, #tpu.memory_space<vmem>>, vector<128x16xbf16>
    %c0_5 = arith.constant 0 : index
    %c0_6 = arith.constant 0 : index
    %4 = vector.load %arg5[%c0_5, %c0_6] : memref<8x128xf32, #tpu.memory_space<vmem>>, vector<1x128xf32>
    %c1 = arith.constant 1 : index
    %c0_7 = arith.constant 0 : index
    %5 = vector.load %arg5[%c1, %c0_7] : memref<8x128xf32, #tpu.memory_space<vmem>>, vector<1x128xf32>
    %c0_8 = arith.constant 0 : index
    %c0_9 = arith.constant 0 : index
    %6 = vector.load %arg6[%c0_8, %c0_9] : memref<8x16xf32, #tpu.memory_space<vmem>>, vector<1x16xf32>
    %c1_10 = arith.constant 1 : index
    %c0_11 = arith.constant 0 : index
    %7 = vector.load %arg6[%c1_10, %c0_11] : memref<8x16xf32, #tpu.memory_space<vmem>>, vector<1x16xf32>
    %c0_12 = arith.constant 0 : index
    %c0_13 = arith.constant 0 : index
    %8 = vector.load %arg1[%c0_12, %c0_13] : memref<16x32xbf16, #tpu.memory_space<vmem>>, vector<16x32xbf16>
    %cst = arith.constant dense<0.000000e+00> : vector<16x128xf32>
    %9 = tpu.matmul %8, %0, %cst {dimension_numbers = #tpu.dot_dimension_numbers<[1], [0], [0], [1], [0, 0, 1, 1], [], []>} : vector<16x32xbf16>, vector<32x128xbf16>, vector<16x128xf32> -> vector<16x128xf32>
    %c0_14 = arith.constant 0 : index
    %c0_15 = arith.constant 0 : index
    %10 = vector.load %arg2[%c0_14, %c0_15] : memref<16x16xbf16, #tpu.memory_space<vmem>>, vector<16x16xbf16>
    %cst_16 = arith.constant dense<0.000000e+00> : vector<16x128xf32>
    %11 = tpu.matmul %10, %1, %cst_16 {dimension_numbers = #tpu.dot_dimension_numbers<[1], [0], [0], [1], [0, 0, 1, 1], [], []>} : vector<16x16xbf16>, vector<16x128xbf16>, vector<16x128xf32> -> vector<16x128xf32>
    %12 = arith.addf %9, %11 : vector<16x128xf32>
    %13 = vector.broadcast %4 : vector<1x128xf32> to vector<16x128xf32>
    %14 = arith.addf %12, %13 : vector<16x128xf32>
    %cst_17 = arith.constant 0.000000e+00 : f32
    %15 = vector.broadcast %cst_17 : f32 to vector<16x128xf32>
    %16 = arith.maximumf %14, %15 : vector<16x128xf32>
    %17 = arith.truncf %16 : vector<16x128xf32> to vector<16x128xbf16>
    %cst_18 = arith.constant dense<0.000000e+00> : vector<16x128xf32>
    %18 = tpu.matmul %17, %2, %cst_18 {dimension_numbers = #tpu.dot_dimension_numbers<[1], [0], [0], [1], [0, 0, 1, 1], [], []>} : vector<16x128xbf16>, vector<128x128xbf16>, vector<16x128xf32> -> vector<16x128xf32>
    %19 = vector.broadcast %5 : vector<1x128xf32> to vector<16x128xf32>
    %20 = arith.addf %18, %19 : vector<16x128xf32>
    %cst_19 = arith.constant 0.000000e+00 : f32
    %21 = vector.broadcast %cst_19 : f32 to vector<16x128xf32>
    %22 = arith.maximumf %20, %21 : vector<16x128xf32>
    %23 = arith.truncf %22 : vector<16x128xf32> to vector<16x128xbf16>
    %cst_20 = arith.constant dense<0.000000e+00> : vector<16x16xf32>
    %24 = tpu.matmul %23, %3, %cst_20 {dimension_numbers = #tpu.dot_dimension_numbers<[1], [0], [0], [1], [0, 0, 1, 1], [], []>} : vector<16x128xbf16>, vector<128x16xbf16>, vector<16x16xf32> -> vector<16x16xf32>
    %25 = vector.broadcast %6 : vector<1x16xf32> to vector<16x16xf32>
    %26 = arith.addf %24, %25 : vector<16x16xf32>
    %27 = math.tanh %26 : vector<16x16xf32>
    %28 = arith.subf %27, %26 : vector<16x16xf32>
    %29 = vector.broadcast %7 : vector<1x16xf32> to vector<16x16xf32>
    %30 = arith.mulf %29, %28 : vector<16x16xf32>
    %31 = arith.addf %26, %30 : vector<16x16xf32>
    %c0_21 = arith.constant 0 : index
    %c0_22 = arith.constant 0 : index
    %32 = vector.load %arg7[%c0_21, %c0_22] : memref<16x16xf32, #tpu.memory_space<vmem>>, vector<16x16xf32>
    tpu.vector_store %arg7[%c0_21, %c0_22], %31 {strides = array<i32>} : memref<16x16xf32, #tpu.memory_space<vmem>>, vector<16x16xf32>,
    return
  }
  func.func @transform_0(%arg0: i32) -> (i32, i32) {
    %c0_i32 = arith.constant 0 : i32
    %c0_i32_0 = arith.constant 0 : i32
    return %arg0, %c0_i32 : i32, i32
  }
  func.func @transform_1(%arg0: i32) -> (i32, i32) {
    %c0_i32 = arith.constant 0 : i32
    %c0_i32_0 = arith.constant 0 : i32
    return %arg0, %c0_i32 : i32, i32
  }
  func.func @transform_2(%arg0: i32) -> (i32, i32) {
    %c0_i32 = arith.constant 0 : i32
    %c0_i32_0 = arith.constant 0 : i32
    %c0_i32_1 = arith.constant 0 : i32
    return %c0_i32, %c0_i32_0 : i32, i32
  }
  func.func @transform_3(%arg0: i32) -> (i32, i32) {
    %c0_i32 = arith.constant 0 : i32
    %c0_i32_0 = arith.constant 0 : i32
    %c0_i32_1 = arith.constant 0 : i32
    return %c0_i32, %c0_i32_0 : i32, i32
  }
  func.func @transform_4(%arg0: i32) -> (i32, i32) {
    %c0_i32 = arith.constant 0 : i32
    %c0_i32_0 = arith.constant 0 : i32
    %c0_i32_1 = arith.constant 0 : i32
    return %c0_i32, %c0_i32_0 : i32, i32
  }
  func.func @transform_5(%arg0: i32) -> (i32, i32) {
    %c0_i32 = arith.constant 0 : i32
    %c0_i32_0 = arith.constant 0 : i32
    %c0_i32_1 = arith.constant 0 : i32
    return %c0_i32, %c0_i32_0 : i32, i32
  }
  func.func @transform_6(%arg0: i32) -> (i32, i32) {
    %c0_i32 = arith.constant 0 : i32
    %c0_i32_0 = arith.constant 0 : i32
    return %arg0, %c0_i32 : i32, i32
  }
}

</mosaic_0001>

<bundles_post_ra>
// kernel: tpu_custom_call.1
= control target key start
LH: loop header
LB: loop body
LE: loop exit
PB: predicated region body
PF: predicated region fallthrough
CT: control target
= control target key end

     0   :  { %11 = vsyncpa [#allocation3], 0  ;;  %s756_s0 = inlined_call_operand.vmem [shape: bf16[16,32], index: 0, kind: input, shape index: {}]   ;;  %s757_s1 = inlined_call_operand.vmem [shape: bf16[16,16], index: 1, kind: input, shape index: {}]   ;;  %s758_s2 = inlined_call_operand.hbm [shape: bf16[176,128], index: 2, kind: input, shape index: {}]   ;;  %s759_s3 = inlined_call_operand.vmem [shape: bf16[128,16], index: 3, kind: input, shape index: {}]   ;;  %s760_s4 = inlined_call_operand.vmem [shape: f32[8,128], index: 4, kind: input, shape index: {}]   ;;  %s761_s5 = inlined_call_operand.vmem [shape: f32[8,16], index: 5, kind: input, shape index: {}]   ;;  %s762_s6 = inlined_call_operand.hbm [shape: f32[16,16], index: 6, kind: output, shape index: {}]  }
   0x1   :  { %12 = vsyncpa [#allocation4], 0  ;;  %s617_s21 = smov [#allocation2]   ;;  %s569_s25 = scalar_lea.hbm %s758_s2, 1408 }
   0x2   :  { %s22_s22 = sshll.u32 %s617_s21, 4  ;;  %p570_p0 = scmp.ne.s32.totalorder %s758_s2, %s569_s25  ;;  %s23_s22 = int_to_ptr.vmem [resolvable:$true] %s22_s22 }
   0x3   :  { %p573_p1 = scmp.lt.u32.totalorder %s569_s25, %s758_s2 }
   0x5   :  { %p575_p2 = pnand %p573_p1, %p570_p0 }
   0x7   :  { %578 = shalt.err (!%p575_p2)
}
   0x8   :  { %s579_s30 = scalar_lea.vmem %s23_s22, 1408  ;;  %p584_p4 = scmp.lt.s32.totalorder %s23_s22, %s23_s22 }
   0x9   :  { %p580_p3 = scmp.ne.s32.totalorder %s23_s22, %s579_s30  ;;  %p585_p5 = scmp.lt.s32.totalorder %s579_s30, %s579_s30 }
   0xb   :  { %p586_p6 = por %p585_p5, %p584_p4 }
   0xd   :  { %p587_p7 = pnand %p586_p6, %p580_p3 }
   0xf   :  { %590 = shalt.err (!%p587_p7)
}
  0x10   :  { %s618_s7 = smov 64   ;;  %s619_s8 = smov 4  }
  0x11   :  { %28 = dma.hbm_to_vmem [thread:$0]  %s758_s2, 1408, %s23_s22, [#allocation3], %s618_s7, %s618_s7, %s619_s8  }
  0x12   :  { %613 = dma.done.wait [#allocation3], 1408  }
  0x13   :  { %614 = vsyncadd [#allocation3], 4294965888  ;;  %v620_v0 = vmov 0.0   ;;  %vm621_vm0 = vmmov 0   ;;  %v544_v1 = vld [vmem:[#allocation2] sm:$0xff]   ;;  %v545_v2 = vld [vmem:[#allocation2 + $0x10] sm:$0xff]  }
  0x14   :  { %488 = vmatprep.subr.bf16.mxu1 %v620_v0  ;;  %482 = vmatprep.subr.bf16.mxu0 %v620_v0  ;;  %v546_v3 = vld [vmem:[%s757_s1] sm:$0xff]   ;;  %vm96_vm1 = vcmask 130048   ;;  %v547_v4 = vld [vmem:[#allocation2 + $0x8] sm:$0xff]   ;;  %v549_v6 = vld [vmem:[#allocation2 + $0x18] sm:$0xff]   ;;  %vm158_vm2 = vcmask 261120   ;;  %s622_s10 = smov [#allocation5]  }
  0x15   :  { %484 = vmatprep.mubr.msk.bf16.mxu0 %vm621_vm0, %v620_v0  ;;  %492 = vmatprep.mubr.msk.bf16.mxu1 %vm621_vm0, %v620_v0  ;;  %v548_v5 = vld [vmem:[%s756_s0] sm:$0xff]   ;;  %v551_v8 = vld [vmem:[#allocation2 + $0x28] sm:$0xff]   ;;  %v552_v9 = vld [vmem:[#allocation2 + $0x30] sm:$0xff]   ;;  %s420_s11 = sshll.u32 %s622_s10, 4  ;;  %s421_s11 = int_to_ptr.vmem [resolvable:$true] %s420_s11 }
  0x16   :  { %489 = vmatpush3.bf16.msra.mxu1 %v544_v1  ;;  %483 = vmatpush3.bf16.msra.mxu0 %v545_v2  ;;  %v550_v7 = vld [vmem:[#allocation2 + $0x20] sm:$0xff]   ;;  %v553_v10 = vld [vmem:[#allocation2 + $0x38] sm:$0xff]   ;;  %v555_v12 = vld [vmem:[#allocation2 + $0x48] sm:$0xff]   ;;  %s591_s12 = scalar_lea.vmem %s421_s11, 256  ;;  %p596_p9 = scmp.lt.s32.totalorder %s421_s11, %s421_s11 }
  0x17   :  { %490 = vmatprep.subr.bf16.mxu1 %v620_v0  ;;  %496 = vmatprep.subr.bf16.mxu0 %v620_v0  ;;  %v554_v11 = vld [vmem:[#allocation2 + $0x40] sm:$0xff]   ;;  %v556_v13 = vld [vmem:[#allocation2 + $0x50] sm:$0xff]   ;;  %v558_v15 = vld [vmem:[%s759_s3 + $0x8] sm:$0xff]   ;;  %p592_p8 = scmp.ne.s32.totalorder %s421_s11, %s591_s12  ;;  %p597_p10 = scmp.lt.s32.totalorder %s591_s12, %s591_s12 }
  0x18   :  { %v557_v14 = vld [vmem:[%s759_s3] sm:$0xff]   ;;  %v559_v16 = vld [vmem:[%s759_s3 + $0x10] sm:$0xff]   ;;  %v560_v17 = vld [vmem:[%s759_s3 + $0x18] sm:$0xff]  }
  0x19   :  { %485 = vmatmul.mubr.msk.bf16.vlgmr.msra.gmra.mrb[0].mxu0 %vm96_vm1, %v546_v3  ;;  %v561_v18 = vld [vmem:[%s759_s3 + $0x20] sm:$0xff]   ;;  %v562_v19 = vld [vmem:[%s759_s3 + $0x28] sm:$0xff]   ;;  %v563_v36 = vld [vmem:[%s759_s3 + $0x30] sm:$0xff]   ;;  %p598_p11 = por %p597_p10, %p596_p9 }
  0x1a   :  { %491 = vmatpush3.bf16.msra.mxu1 %v547_v4  ;;  %497 = vmatpush3.bf16.msra.mxu0 %v549_v6  ;;  %v439_v24 = vld [vmem:[%s760_s4] ss:$0 sm:$0xff]  ;;  %v564_v37 = vld [vmem:[%s759_s3 + $0x38] sm:$0xff]   ;;  %v440_v38 = vld [vmem:[%s760_s4 + $0x1] ss:$0 sm:$0xff] }
  0x1b   :  { %512 = vmatprep.mubr.msk.bf16.mxu0 %vm621_vm0, %v620_v0  ;;  %498 = vmatprep.subr.bf16.mxu0 %v620_v0  ;;  %v449_v48 = vld [vmem:[%s761_s5] ss:$0 sm:$0xff]  ;;  %v458_v56 = vld [vmem:[%s761_s5 + $0x1] ss:$0 sm:$0xff]  ;;  %p599_p12 = pnand %p598_p11, %p592_p8 }
  0x1c   :  { %516 = vmatprep.subr.bf16.mxu1 %v620_v0 }
  0x1d   :  { %493 = vmatmul.mubr.msk.bf16.vlgmr.msra.gmra.mrb[0].mxu1 %vm158_vm2, %v548_v5 }
  0x1e   :  { %532 = vmatprep.mubr.msk.bf16.mxu1 %vm621_vm0, %v620_v0  ;;  %499 = vmatpush3.bf16.msra.mxu0 %v550_v7 }
  0x1f   :  { %500 = vmatprep.subr.bf16.mxu0 %v620_v0  ;;  %517 = vmatpush3.bf16.msra.mxu1 %v557_v14 }
  0x20   :  { %518 = vmatprep.subr.bf16.mxu1 %v620_v0 }
  0x22   :  { %501 = vmatpush3.bf16.msra.mxu0 %v551_v8 }
  0x23   :  { %502 = vmatprep.subr.bf16.mxu0 %v620_v0  ;;  %519 = vmatpush3.bf16.msra.mxu1 %v558_v15 }
  0x24   :  { %520 = vmatprep.subr.bf16.mxu1 %v620_v0 }
  0x26   :  { %503 = vmatpush3.bf16.msra.mxu0 %v552_v9 }
  0x27   :  { %504 = vmatprep.subr.bf16.mxu0 %v620_v0  ;;  %521 = vmatpush3.bf16.msra.mxu1 %v559_v16 }
  0x28   :  { %522 = vmatprep.subr.bf16.mxu1 %v620_v0 }
  0x2a   :  { %505 = vmatpush3.bf16.msra.mxu0 %v553_v10 }
  0x2b   :  { %506 = vmatprep.subr.bf16.mxu0 %v620_v0  ;;  %523 = vmatpush3.bf16.msra.mxu1 %v560_v17 }
  0x2c   :  { %524 = vmatprep.subr.bf16.mxu1 %v620_v0 }
  0x2e   :  { %507 = vmatpush3.bf16.msra.mxu0 %v554_v11 }
  0x2f   :  { %508 = vmatprep.subr.bf16.mxu0 %v620_v0  ;;  %525 = vmatpush3.bf16.msra.mxu1 %v561_v18 }
  0x30   :  { %526 = vmatprep.subr.bf16.mxu1 %v620_v0 }
  0x32   :  { %509 = vmatpush3.bf16.msra.mxu0 %v555_v12 }
  0x33   :  { %510 = vmatprep.subr.bf16.mxu0 %v620_v0  ;;  %527 = vmatpush3.bf16.msra.mxu1 %v562_v19 }
  0x34   :  { %528 = vmatprep.subr.bf16.mxu1 %v620_v0 }
  0x36   :  { %511 = vmatpush3.bf16.msra.mxu0 %v556_v13 }
  0x37   :  { %529 = vmatpush3.bf16.msra.mxu1 %v563_v36 }
  0x38   :  { %530 = vmatprep.subr.bf16.mxu1 %v620_v0 }
  0x3b   :  { %531 = vmatpush3.bf16.msra.mxu1 %v564_v37 }
  0xec   :  { %v134_v20 = vpop.f32.mrb[0].mxu0 }
  0xed   :  { %v486_v21 = vpop.f32.mrb[1].mxu0 }
  0xee   :  { %v137_v22 = vpop.f32.mrb[2].mxu0 }
  0xef   :  { %v487_v23 = vpop.f32.mrb[3].mxu0 }
  0xf0   :  { %v196_v25 = vpop.f32.mrb[0].mxu1 }
  0xf1   :  { %v197_v26 = vadd.f32 %v196_v25, %v134_v20  ;;  %v494_v27 = vpop.f32.mrb[1].mxu1 }
  0xf2   :  { %v199_v28 = vpop.f32.mrb[2].mxu1 }
  0xf3   :  { %v207_v29 = vadd.f32 %v439_v24, %v197_v26  ;;  %v200_v30 = vadd.f32 %v199_v28, %v137_v22  ;;  %v495_v31 = vpop.f32.mrb[3].mxu1 }
  0xf5   :  { %v208_v32 = vadd.f32 %v439_v24, %v200_v30  ;;  %v209_v33 = vmax.f32 %v207_v29, 0.0 }
  0xf7   :  { %v210_v34 = vmax.f32 %v208_v32, 0.0 }
  0xf9   :  { %v211_v35 = vpack.c.bf16 %v210_v34, %v209_v33 }
  0xfb   :  { %513 = vmatmul.mubr.bf16.vlgmr.msra.gmra.mrb[4].mxu0 %v211_v35 }
 0x1ce   :  { %v298_v39 = vpop.f32.mrb[4].mxu0 }
 0x1cf   :  { %v299_v40 = vadd.f32 %v440_v38, %v298_v39  ;;  %v514_v41 = vpop.f32.mrb[5].mxu0 }
 0x1d0   :  { %v301_v42 = vpop.f32.mrb[6].mxu0 }
 0x1d1   :  { %v302_v43 = vadd.f32 %v440_v38, %v301_v42  ;;  %v515_v44 = vpop.f32.mrb[7].mxu0  ;;  %v305_v45 = vmax.f32 %v299_v40, 0.0 }
 0x1d3   :  { %v306_v46 = vmax.f32 %v302_v43, 0.0 }
 0x1d5   :  { %v307_v47 = vpack.c.bf16 %v306_v46, %v305_v45 }
 0x1d7   :  { %533 = vmatmul.mubr.bf16.vlgmr.msra.gmra.mrb[4].mxu1 %v307_v47 }
 0x2aa   :  { %v394_v49 = vpop.f32.mrb[4].mxu1 }
 0x2ab   :  { %v395_v50 = vadd.f32 %v449_v48, %v394_v49  ;;  %v534_v51 = vpop.f32.mrb[5].mxu1 }
 0x2ac   :  { %v397_v52 = vpop.f32.mrb[6].mxu1 }
 0x2ad   :  { %565 = vtanh.f32 %v395_v50  ;;  %v398_v53 = vadd.f32 %v449_v48, %v397_v52  ;;  %v535_v54 = vpop.f32.mrb[7].mxu1 }
 0x2af   :  { %567 = vtanh.f32 %v398_v53 }
 0x2b7   :  { %v566_v55 = vpop.eup %565 }
 0x2b8   :  { %v403_v57 = vsub.f32 %v566_v55, %v395_v50 }
 0x2b9   :  { %v568_v58 = vpop.eup %567 }
 0x2ba   :  { %v409_v59 = vmul.f32 %v458_v56, %v403_v57  ;;  %v404_v60 = vsub.f32 %v568_v58, %v398_v53 }
 0x2bc   :  { %v411_v61 = vadd.f32 %v409_v59, %v395_v50  ;;  %v410_v62 = vmul.f32 %v458_v56, %v404_v60 }
 0x2be   :  { %413 = vst.msk [vmem:[#allocation5] sm:$0xff] %vm96_vm1, %v411_v61  ;;  %v412_v63 = vadd.f32 %v410_v62, %v398_v53 }
 0x2c0   :  { %414 = vst.msk [vmem:[#allocation5 + $0x8] sm:$0xff] %vm96_vm1, %v412_v63 }
 0x2c1   :  { %602 = shalt.err (!%p599_p12)
}
 0x2c2   :  { %s603_s13 = scalar_lea.hbm %s762_s6, 256 }
 0x2c3   :  { %p604_p13 = scmp.ne.s32.totalorder %s762_s6, %s603_s13  ;;  %p607_p0 = scmp.lt.u32.totalorder %s603_s13, %s762_s6 }
 0x2c5   :  { %p609_p1 = pnand %p607_p0, %p604_p13 }
 0x2c7   :  { %612 = shalt.err (!%p609_p1)
}
 0x2c8   :  { %s623_s16 = smov 128   ;;  %s624_s17 = smov 8  }
 0x2c9   :  { %426 = dma.vmem_to_hbm [thread:$0]  %s421_s11, 256, %s762_s6, [#allocation4], %s623_s16, %s623_s16, %s624_s17  }
 0x2ca   :  { %615 = dma.done.wait [#allocation4], 256  }
 0x2cb   :  { %616 = vsyncadd [#allocation4], 4294967040 }
 0x2cc   :  { %430 = vsyncpa [#allocation3], 1 }
 0x2cd   :  { %431 = vsyncpa [#allocation4], 1 }

</bundles_post_ra>
